<compile_context>
chip_gen: v7x
topology: tpu7x:2x2x1
jax: 0.10.0
libtpu: 0.0.40
codegen_flags: <defaults>
</compile_context>

<pallas_src>
import functools

import jax
import jax.numpy as jnp
from jax.experimental import pallas as pl
from jax.experimental.pallas import tpu as pltpu


def _round_up(n, m):
    return ((n + m - 1) // m) * m


def _mlp_kernel(x_ref, w1_ref, b1_ref, w2_ref, b2_ref, o_ref):
    # x tile arrives in f32 (no wrapper-side bf16 round trip through HBM);
    # cast to bf16 right before the MXU.
    x = x_ref[...].astype(jnp.bfloat16)
    # First linear: (TR, Fp) bf16 @ (Fp, Hp) bf16 -> f32 accumulation on MXU.
    h = jnp.dot(x, w1_ref[...], preferred_element_type=jnp.float32)
    # Bias + ReLU in f32 on the VPU (v5e has no bf16 VPU path).
    h = jnp.maximum(h + b1_ref[...], 0.0)
    # Second linear straight from registers; hidden stays f32 (no extra cast,
    # tighter numerics; MXU handles the promoted contraction).
    y = jnp.dot(h, w2_ref[...], preferred_element_type=jnp.float32)
    o_ref[...] = (y + b2_ref[...]).astype(o_ref.dtype)


def _vmem_budget_bytes():
    # v5e / v6e have 128 MiB VMEM; leave headroom under v7x's 64 MiB otherwise.
    try:
        kind = jax.devices()[0].device_kind.lower()
    except Exception:
        kind = ""
    if "v5" in kind or "v6" in kind:
        return 96 * 1024 * 1024
    return 48 * 1024 * 1024


@functools.partial(jax.jit, static_argnames=("out_feat", "tr_max"))
def pallas_mlp(x2d, w1p, b1p, w2p, b2p, *, out_feat, tr_max=512):
    """x2d: (R, F) f32.  Weights/biases already padded + cast (once, at init).

    Returns (R, out_feat) f32.  Row-tiled grid; weights resident in VMEM.
    """
    R, F = x2d.shape
    Fp, Hp = w1p.shape
    Op = w2p.shape[1]

    vmem_budget = _vmem_budget_bytes()

    # Row tile: at least two grid steps when R is small so both v7x
    # TensorCores get work; otherwise the biggest tile under the VMEM budget.
    tr = min(tr_max, max(8, _round_up(pl.cdiv(R, 2), 8)))

    def vmem_bytes(t):
        # x/out tiles double-buffered (f32); weights + biases single-buffered.
        return (2 * t * Fp * 4 + 2 * t * Op * 4
                + Fp * Hp * 2 + Hp * Op * 2 + (Hp + Op) * 4)

    while tr > 8 and vmem_bytes(tr) > vmem_budget:
        tr = _round_up(tr // 2, 8)
    # NOTE: if the two weight matrices alone ever blow the budget, the right
    # fix is a K / H grid axis with a f32 VMEM accumulator (pl.when init /
    # finalize), not shrinking tr further.  Not needed at these sizes.

    Rp = _round_up(R, tr)
    xp = jnp.zeros((Rp, Fp), jnp.float32).at[:R, :F].set(x2d)

    grid = (Rp // tr,)
    flops = 2 * Rp * (Fp * Hp + Hp * Op)
    bytes_accessed = (Rp * Fp * 4                    # x read once, f32
                      + Fp * Hp * 2 + Hp * Op * 2    # bf16 weights, read once
                      + (Hp + Op) * 4                # f32 biases
                      + Rp * Op * 4)                 # f32 output write

    resident = dict(pipeline_mode=pl.Buffered(1))    # constant blocks: 1 buffer

    yp = pl.pallas_call(
        _mlp_kernel,
        out_shape=jax.ShapeDtypeStruct((Rp, Op), jnp.float32),
        grid_spec=pltpu.PrefetchScalarGridSpec(
            num_scalar_prefetch=0,
            grid=grid,
            in_specs=[
                pl.BlockSpec((tr, Fp), lambda i: (i, 0)),        # streamed x
                pl.BlockSpec((Fp, Hp), lambda i: (0, 0), **resident),
                pl.BlockSpec((1, Hp), lambda i: (0, 0), **resident),
                pl.BlockSpec((Hp, Op), lambda i: (0, 0), **resident),
                pl.BlockSpec((1, Op), lambda i: (0, 0), **resident),
            ],
            out_specs=pl.BlockSpec((tr, Op), lambda i: (i, 0)),  # lane-dense
        ),
        compiler_params=pltpu.CompilerParams(
            dimension_semantics=("parallel",),
            vmem_limit_bytes=vmem_budget,
        ),
        cost_estimate=pl.CostEstimate(
            flops=flops, transcendentals=0, bytes_accessed=bytes_accessed),
    )(xp, w1p, b1p, w2p, b2p)

    return yp[:R, :out_feat]


class InnerMLP:
    """Representative inner `module`: Linear(F->H) -> ReLU -> Linear(H->O).

    Weight padding + bf16 cast is done ONCE here, not per forward call.
    """

    def __init__(self, key, in_feat, hidden, out_feat):
        k1, k2, k3, k4 = jax.random.split(key, 4)
        self.in_feat, self.hidden, self.out_feat = in_feat, hidden, out_feat
        self.w1 = jax.random.normal(k1, (in_feat, hidden), jnp.float32) * 0.05
        self.b1 = jax.random.normal(k2, (1, hidden), jnp.float32) * 0.01
        self.w2 = jax.random.normal(k3, (hidden, out_feat), jnp.float32) * 0.05
        self.b2 = jax.random.normal(k4, (1, out_feat), jnp.float32) * 0.01

        # Lane-dense / MXU-aligned zero padding (exact: padded x-cols x padded
        # w1-rows contribute 0, padded hidden units have zero bias and zero w2
        # rows, padded out-cols are sliced off).  128-alignment is ideal on
        # v5e; for large models on v6e/v7x one would round H/O to 256 instead.
        Fp, Hp, Op = (_round_up(d, 128) for d in (in_feat, hidden, out_feat))
        self.w1p = jnp.zeros((Fp, Hp), jnp.bfloat16).at[:in_feat, :hidden].set(
            self.w1.astype(jnp.bfloat16))
        self.b1p = jnp.zeros((1, Hp), jnp.float32).at[:, :hidden].set(self.b1)
        self.w2p = jnp.zeros((Hp, Op), jnp.bfloat16).at[:hidden, :out_feat].set(
            self.w2.astype(jnp.bfloat16))
        self.b2p = jnp.zeros((1, Op), jnp.float32).at[:, :out_feat].set(self.b2)

    def __call__(self, x):
        # x: (batch, seq, feat) -> flatten rows (glue), kernel, reshape back.
        B, S, F = x.shape
        y2d = pallas_mlp(x.reshape(B * S, F), self.w1p, self.b1p,
                         self.w2p, self.b2p, out_feat=self.out_feat)
        return y2d.reshape(B, S, self.out_feat)


class WrappedModel:
    """Exact semantics of the PyTorch WrappedModel: forward(x) = module(x)."""

    def __init__(self, module):
        self.module = module

    def __call__(self, x):
        return self.module(x)


def _reference(x, m: InnerMLP):
    # Pure f32 reference of the module semantics.
    B, S, F = x.shape
    x2d = x.reshape(B * S, F)
    h = jnp.maximum(x2d @ m.w1 + m.b1, 0.0)
    y = h @ m.w2 + m.b2
    return y.reshape(B, S, -1)


if __name__ == "__main__":
    key = jax.random.PRNGKey(0)
    k_x, k_p = jax.random.split(key)

    batch, seq, feat, hidden, out_feat = 2, 8, 32, 64, 32
    x = jax.random.normal(k_x, (batch, seq, feat), jnp.float32)

    inner = InnerMLP(k_p, feat, hidden, out_feat)
    model = WrappedModel(inner)

    y = jax.block_until_ready(model(x))

    y_ref = _reference(x, inner)
    assert y.shape == (batch, seq, out_feat), y.shape
    # bf16 MXU operands (x, w1, w2) with f32 accumulation -> loose tolerance.
    assert jnp.allclose(y, y_ref, atol=2e-2, rtol=2e-2), "mismatch vs reference"

    print("KERNEL_OK")
</pallas_src>

<mosaic_0001>
module attributes {stable_mosaic.version = 11 : i64} {
  func.func @_mlp_kernel(%arg0: i32, %arg1: memref<8x128xf32, #tpu.memory_space<vmem>>, %arg2: memref<128x128xbf16, #tpu.memory_space<vmem>>, %arg3: memref<1x128xf32, #tpu.memory_space<vmem>>, %arg4: memref<128x128xbf16, #tpu.memory_space<vmem>>, %arg5: memref<1x128xf32, #tpu.memory_space<vmem>>, %arg6: memref<8x128xf32, #tpu.memory_space<vmem>>) attributes {dimension_semantics = [#tpu.dimension_semantics<parallel>], iteration_bounds = array<i64: 2>, scalar_prefetch = 0 : i64, scratch_operands = 0 : i64, tpu.core_type = #tpu.core_type<tc>, window_params = [{transform_indices = @transform_0, window_bounds = array<i64: 8, 128>}, {pipeline_mode = #tpu.pipeline_mode<synchronous>, transform_indices = @transform_1, window_bounds = array<i64: 128, 128>}, {pipeline_mode = #tpu.pipeline_mode<synchronous>, transform_indices = @transform_2, window_bounds = array<i64: 1, 128>}, {pipeline_mode = #tpu.pipeline_mode<synchronous>, transform_indices = @transform_3, window_bounds = array<i64: 128, 128>}, {pipeline_mode = #tpu.pipeline_mode<synchronous>, transform_indices = @transform_4, window_bounds = array<i64: 1, 128>}, {transform_indices = @transform_5, window_bounds = array<i64: 8, 128>}]} {
    %c0 = arith.constant 0 : index
    %c0_0 = arith.constant 0 : index
    %0 = vector.load %arg1[%c0, %c0_0] : memref<8x128xf32, #tpu.memory_space<vmem>>, vector<8x128xf32>
    %1 = arith.truncf %0 : vector<8x128xf32> to vector<8x128xbf16>
    %c0_1 = arith.constant 0 : index
    %c0_2 = arith.constant 0 : index
    %2 = vector.load %arg2[%c0_1, %c0_2] : memref<128x128xbf16, #tpu.memory_space<vmem>>, vector<128x128xbf16>
    %cst = arith.constant dense<0.000000e+00> : vector<8x128xf32>
    %3 = tpu.matmul %1, %2, %cst {dimension_numbers = #tpu.dot_dimension_numbers<[1], [0], [0], [1], [0, 0, 1, 1], [], []>} : vector<8x128xbf16>, vector<128x128xbf16>, vector<8x128xf32> -> vector<8x128xf32>
    %c0_3 = arith.constant 0 : index
    %c0_4 = arith.constant 0 : index
    %4 = vector.load %arg3[%c0_3, %c0_4] : memref<1x128xf32, #tpu.memory_space<vmem>>, vector<1x128xf32>
    %5 = vector.broadcast %4 : vector<1x128xf32> to vector<8x128xf32>
    %6 = arith.addf %3, %5 : vector<8x128xf32>
    %cst_5 = arith.constant 0.000000e+00 : f32
    %7 = vector.broadcast %cst_5 : f32 to vector<8x128xf32>
    %8 = arith.maximumf %6, %7 : vector<8x128xf32>
    %c0_6 = arith.constant 0 : index
    %c0_7 = arith.constant 0 : index
    %9 = vector.load %arg4[%c0_6, %c0_7] : memref<128x128xbf16, #tpu.memory_space<vmem>>, vector<128x128xbf16>
    %cst_8 = arith.constant dense<0.000000e+00> : vector<8x128xf32>
    %10 = tpu.matmul %8, %9, %cst_8 {dimension_numbers = #tpu.dot_dimension_numbers<[1], [0], [0], [1], [0, 0, 1, 1], [], []>} : vector<8x128xf32>, vector<128x128xbf16>, vector<8x128xf32> -> vector<8x128xf32>
    %c0_9 = arith.constant 0 : index
    %c0_10 = arith.constant 0 : index
    %11 = vector.load %arg5[%c0_9, %c0_10] : memref<1x128xf32, #tpu.memory_space<vmem>>, vector<1x128xf32>
    %12 = vector.broadcast %11 : vector<1x128xf32> to vector<8x128xf32>
    %13 = arith.addf %10, %12 : vector<8x128xf32>
    %c0_11 = arith.constant 0 : index
    %c0_12 = arith.constant 0 : index
    %14 = vector.load %arg6[%c0_11, %c0_12] : memref<8x128xf32, #tpu.memory_space<vmem>>, vector<8x128xf32>
    tpu.vector_store %arg6[%c0_11, %c0_12], %13 {strides = array<i32>} : memref<8x128xf32, #tpu.memory_space<vmem>>, vector<8x128xf32>,
    return
  }
  func.func @transform_0(%arg0: i32) -> (i32, i32) {
    %c0_i32 = arith.constant 0 : i32
    %c0_i32_0 = arith.constant 0 : i32
    return %arg0, %c0_i32 : i32, i32
  }
  func.func @transform_1(%arg0: i32) -> (i32, i32) {
    %c0_i32 = arith.constant 0 : i32
    %c0_i32_0 = arith.constant 0 : i32
    %c0_i32_1 = arith.constant 0 : i32
    return %c0_i32, %c0_i32_0 : i32, i32
  }
  func.func @transform_2(%arg0: i32) -> (i32, i32) {
    %c0_i32 = arith.constant 0 : i32
    %c0_i32_0 = arith.constant 0 : i32
    %c0_i32_1 = arith.constant 0 : i32
    return %c0_i32, %c0_i32_0 : i32, i32
  }
  func.func @transform_3(%arg0: i32) -> (i32, i32) {
    %c0_i32 = arith.constant 0 : i32
    %c0_i32_0 = arith.constant 0 : i32
    %c0_i32_1 = arith.constant 0 : i32
    return %c0_i32, %c0_i32_0 : i32, i32
  }
  func.func @transform_4(%arg0: i32) -> (i32, i32) {
    %c0_i32 = arith.constant 0 : i32
    %c0_i32_0 = arith.constant 0 : i32
    %c0_i32_1 = arith.constant 0 : i32
    return %c0_i32, %c0_i32_0 : i32, i32
  }
  func.func @transform_5(%arg0: i32) -> (i32, i32) {
    %c0_i32 = arith.constant 0 : i32
    %c0_i32_0 = arith.constant 0 : i32
    return %arg0, %c0_i32 : i32, i32
  }
}

</mosaic_0001>

<bundles_post_ra>
// kernel: pallas_mlp.1
= control target key start
LH: loop header
LB: loop body
LE: loop exit
PB: predicated region body
PF: predicated region fallthrough
CT: control target
= control target key end

     0   :  { %10 = vsyncpa [#allocation3], 0  ;;  %s999_s0 = inlined_call_operand.vmem [shape: f32[16,128], index: 0, kind: input, shape index: {}]   ;;  %s1000_s1 = inlined_call_operand.vmem [shape: bf16[128,128], index: 1, kind: input, shape index: {}]   ;;  %s1001_s2 = inlined_call_operand.vmem [shape: f32[1,128], index: 2, kind: input, shape index: {}]   ;;  %s1002_s3 = inlined_call_operand.hbm [shape: bf16[128,128], index: 3, kind: input, shape index: {}]   ;;  %s1003_s4 = inlined_call_operand.vmem [shape: f32[1,128], index: 4, kind: input, shape index: {}]   ;;  %s1004_s5 = inlined_call_operand.hbm [shape: f32[16,128], index: 5, kind: output, shape index: {}]  }
   0x1   :  { %11 = vsyncpa [#allocation4], 0 }
   0x2   :  { %13 = vsyncpa [#allocation4 + $0x1], 0  ;;  %s834_s18 = smov 0   ;;  %s836_s19 = smov 0  }
   0x3   :  { %s838_s20 = smov 0   ;;  %s840_s21 = smov 0  }
   0x4 LB: > { %s855_s22 = sadd.s32 4294967295, %s796_s21   ;;  %s545_s23 = sadd.s32 4294967294, %s796_s21   ;;  %s796_s21 = sphi %s840_s21, %s1020_s21   ;;  %s792_s20 = sphi %s838_s20, %s1019_s20   ;;  %s788_s19 = sphi %s836_s19, %s1018_s19   ;;  %s784_s18 = sphi %s834_s18, %s1017_s18  }
   0x5   : > { %s859_s24 = sadd.s32 1, %s796_s21   ;;  %s136_s25 = sadd.s32 1, %s792_s20 }
   0x6   : > { %s133_s26 = ssub.s32 %s796_s21, %s859_s24  ;;  %p146_p0 = scmp.ne.s32.totalorder %s792_s20, %s788_s19 }
   0x7   : > { %p134_p1 = scmp.eq.s32.totalorder %s133_s26, 0  ;;  %p147_p2 = scmp.eq.s32.totalorder %s855_s22, 1 }
   0x8   : > { %p152_p3 = scmp.ne.s32.totalorder %s788_s19, %s784_s18  ;;  %p153_p4 = scmp.eq.s32.totalorder %s545_s23, 1 }
   0x9   : > { %s870_s27 = scalar_select %p134_p1, %s792_s20, %s136_s25  }
   0xa   : > { %p872_p5 = por %p147_p2, %p146_p0  ;;  %p876_p6 = por %p153_p4, %p152_p3 }
   0xb   : > { %p546_p7 = scmp.ge.s32.totalorder %s796_s21, 1  ;;  %p160_p8 = scmp.lt.s32.totalorder %s796_s21, 3 }
   0xc   : > { %s1008_s28 = scalar_select %p872_p5, 1, 0 }
   0xd   : > { %s1009_s29 = scalar_select %p876_p6, 1, 0 }
   0xe   : > { %p1005_p9 = scmp.eq.s32.totalorder %s855_s22, 0  ;;  %p883_p10 = pnand %p546_p7, %p160_p8 }
   0xf   : > { %s798_s6 = smov [#allocation2]   ;;  %s702_s11 = scalar_lea.hbm %s1002_s3, 1024 }
  0x10   : > { %s1010_s30 = scalar_select %p883_p10, 1, 0 }
  0x11   : > { %s178_s7 = sshll.u32 %s798_s6, 4  ;;  %p638_p11 = pneg %p883_p10  ;;  %s179_s7 = int_to_ptr.vmem [resolvable:$true] %s178_s7 }
  0x12   : > { %p703_p13 = scmp.ne.s32.totalorder %s1002_s3, %s702_s11  ;;  %p709_p3 = scmp.lt.u32.totalorder %s702_s11, %s1002_s3 }
  0x13   : > { %p891_p12 = pnand %p1005_p9, %p638_p11 }
  0x15   : > { %p704_p0 = pneg %p891_p12 }
  0x17   : > { %p705_p1 = pnand %p704_p0, %p703_p13 }
  0x19   : > { %p706_p2 = pneg %p705_p1 }
  0x1b   : > { %p711_p4 = pnand %p709_p3, %p706_p2 }
  0x1d   : > { %714 = shalt.err (!%p711_p4)
}
  0x1e   : > { %s715_s16 = scalar_lea.vmem %s179_s7, 1024  ;;  %p723_p9 = scmp.lt.s32.totalorder %s179_s7, %s179_s7 }
  0x1f   : > { %p716_p7 = scmp.ne.s32.totalorder %s179_s7, %s715_s16  ;;  %p724_p6 = scmp.lt.s32.totalorder %s715_s16, %s715_s16 }
  0x21   : > { %p718_p8 = pnand %p716_p7, %p704_p0  ;;  %p725_p5 = por %p724_p6, %p723_p9 }
  0x23   : > { %p719_p11 = pneg %p718_p8 }
  0x25   : > { %p726_p10 = pnand %p725_p5, %p719_p11 }
  0x27   : > { %729 = shalt.err (!%p726_p10)
}
  0x28   : > { %s799_s17 = smov 64   ;;  %s800_s23 = smov 4  }
  0x29   : > { %641 = dma.hbm_to_vmem [thread:$0]  (!%p891_p12), %s1002_s3, 1024, %s179_s7, [#allocation3], %s799_s17, %s799_s17, %s800_s23  }
  0x2a   : > { %p1012_p13 = scmp.ne.s32.totalorder %s1010_s30, 0 }
  0x2b   : > { %p1013_p1 = scmp.eq.s32.totalorder (!%p1012_p13), %s855_s22, 0 }
  0x2c   : > { %204 = sbr.rel (%p1012_p13) target bundleno = 530 (0x212), region = 40 }
  0x33   : > { %775 = dma.done.wait (%p1013_p1), [#allocation3], 1024   ;;  %p1014_p0 = pmov %p1013_p1 }
  0x34   : > { %v801_v0 = vmov 0.0   ;;  %vm802_vm0 = vmmov 0   ;;  %v686_v1 = vld [vmem:[%s1000_s1] sm:$0xff]   ;;  %v687_v2 = vld [vmem:[%s1000_s1 + $0x8] sm:$0xff]   ;;  %v688_v3 = vld [vmem:[%s1000_s1 + $0x10] sm:$0xff]   ;;  %p231_p5 = scmp.lt.s32.totalorder %s855_s22, 1 }
  0x35   : > { %777 = vsyncadd (%p1014_p0), [#allocation3], 4294966272  ;;  %593 = vmatprep.subr.bf16.mxu0 %v801_v0  ;;  %609 = vmatprep.mubr.msk.bf16.mxu0 %vm802_vm0, %v801_v0  ;;  %v694_v4 = vld [vmem:[#allocation2] sm:$0xff]   ;;  %v689_v5 = vld [vmem:[%s1000_s1 + $0x18] sm:$0xff]   ;;  %s228_s12 = sand.u32 1, %s788_s19   ;;  %s572_s16 = sshll.u32 %s855_s22, 7 }
  0x36   : > { %613 = vmatprep.subr.bf16.mxu1 %v801_v0  ;;  %629 = vmatprep.mubr.msk.f32.mxu1 %vm802_vm0, %v801_v0  ;;  %v695_v6 = vld [vmem:[#allocation2 + $0x8] sm:$0xff]   ;;  %v690_v7 = vld [vmem:[%s1000_s1 + $0x20] sm:$0xff]   ;;  %v696_v8 = vld [vmem:[#allocation2 + $0x10] sm:$0xff]   ;;  %s232_s15 = scalar_select %p231_p5, %s855_s22, 1 }
  0x37   : > { %594 = vmatpush3.bf16.msra.mxu0 %v686_v1  ;;  %614 = vmatpush3.bf16.msra.mxu1 %v694_v4  ;;  %v691_v9 = vld [vmem:[%s1000_s1 + $0x28] sm:$0xff]   ;;  %v697_v10 = vld [vmem:[#allocation2 + $0x18] sm:$0xff]   ;;  %v692_v11 = vld [vmem:[%s1000_s1 + $0x30] sm:$0xff]   ;;  %s551_s13 = sshll.u32 %s228_s12, 3  ;;  %s957_s6 = scalar_lea.hbm %s1004_s5, %s572_s16 }
  0x38   : > { %595 = vmatprep.subr.bf16.mxu0 %v801_v0  ;;  %615 = vmatprep.subr.bf16.mxu1 %v801_v0  ;;  %s552_s23 = sshll.u32 %s232_s15, 3  ;;  %v698_v12 = vld [vmem:[#allocation2 + $0x20] sm:$0xff]   ;;  %v693_v13 = vld [vmem:[%s1000_s1 + $0x38] sm:$0xff]   ;;  %v699_v15 = vld [vmem:[#allocation2 + $0x28] sm:$0xff]   ;;  %s230_s17 = scalar_lea.vmem [#allocation5], %s551_s13 }
  0x39   : > { %s234_s30 = scalar_lea.vmem %s999_s0, %s552_s23  ;;  %v700_v17 = vld [vmem:[#allocation2 + $0x30] sm:$0xff]   ;;  %v701_v18 = vld [vmem:[#allocation2 + $0x38] sm:$0xff]   ;;  %v553_v19 = vld [vmem:[%s1001_s2] ss:$0 sm:$0xff]  ;;  %s474_s23 = sshll.u32 %s230_s17, 4  ;;  %s959_s23 = int_to_ptr.vmem [resolvable:$true] %s474_s23 }
  0x3a   : > { %v236_v14 = vld [vmem:[%s234_s30] sm:$0xff]  ;;  %s461_s8 = scalar_lea.sflag [#allocation4], %s228_s12  ;;  %s730_s30 = scalar_lea.vmem %s959_s23, 128 }
  0x3b   : > { %596 = vmatpush3.bf16.msra.mxu0 %v687_v2  ;;  %616 = vmatpush3.bf16.msra.mxu1 %v695_v6  ;;  %v237_v16 = vpack.c.bf16 %v236_v14, %v236_v14  ;;  %v562_v26 = vld [vmem:[%s1003_s4] ss:$0 sm:$0xff]  ;;  %p731_p6 = scmp.ne.s32.totalorder %s959_s23, %s730_s30  ;;  %p1015_p9 = scmp.ne.s32.totalorder %s1008_s28, 0 }
  0x3c   : > { %597 = vmatprep.subr.bf16.mxu0 %v801_v0  ;;  %617 = vmatprep.subr.bf16.mxu1 %v801_v0  ;;  %s803_s22 = smov [#allocation5]  }
  0x3d   : > { %p732_p10 = pnand %p731_p6, %p1015_p9  ;;  %s734_s7 = sshll.u32 %s803_s22, 4  ;;  %s735_s7 = int_to_ptr.vmem [resolvable:$false] %s734_s7 }
  0x3e   : > { %s736_s9 = scalar_lea.vmem %s735_s7, 256  ;;  %p737_p2 = scmp.lt.s32.totalorder %s959_s23, %s735_s7 }
  0x3f   : > { %598 = vmatpush3.bf16.msra.mxu0 %v688_v3  ;;  %618 = vmatpush3.bf16.msra.mxu1 %v696_v8  ;;  %p733_p12 = pneg %p732_p10  ;;  %p738_p3 = scmp.lt.s32.totalorder %s736_s9, %s730_s30 }
  0x40   : > { %599 = vmatprep.subr.bf16.mxu0 %v801_v0  ;;  %619 = vmatprep.subr.bf16.mxu1 %v801_v0 }
  0x41   : > { %p739_p4 = por %p738_p3, %p737_p2 }
  0x43   : > { %600 = vmatpush3.bf16.msra.mxu0 %v689_v5  ;;  %620 = vmatpush3.bf16.msra.mxu1 %v697_v10  ;;  %p740_p7 = pnand %p739_p4, %p733_p12 }
  0x44   : > { %601 = vmatprep.subr.bf16.mxu0 %v801_v0  ;;  %621 = vmatprep.subr.bf16.mxu1 %v801_v0 }
  0x47   : > { %602 = vmatpush3.bf16.msra.mxu0 %v690_v7  ;;  %622 = vmatpush3.bf16.msra.mxu1 %v698_v12 }
  0x48   : > { %603 = vmatprep.subr.bf16.mxu0 %v801_v0  ;;  %623 = vmatprep.subr.bf16.mxu1 %v801_v0 }
  0x4b   : > { %604 = vmatpush3.bf16.msra.mxu0 %v691_v9  ;;  %624 = vmatpush3.bf16.msra.mxu1 %v699_v15 }
  0x4c   : > { %605 = vmatprep.subr.bf16.mxu0 %v801_v0  ;;  %625 = vmatprep.subr.bf16.mxu1 %v801_v0 }
  0x4f   : > { %606 = vmatpush3.bf16.msra.mxu0 %v692_v11  ;;  %626 = vmatpush3.bf16.msra.mxu1 %v700_v17 }
  0x50   : > { %607 = vmatprep.subr.bf16.mxu0 %v801_v0  ;;  %627 = vmatprep.subr.bf16.mxu1 %v801_v0 }
  0x53   : > { %608 = vmatpush3.bf16.msra.mxu0 %v693_v13  ;;  %628 = vmatpush3.bf16.msra.mxu1 %v701_v18 }
  0x56   : > { %610 = vmatmul.mubr.bf16.vlgmr.msra.gmra.mrb[0].mxu0 %v237_v16 }
 0x129   : > { %v343_v20 = vpop.f32.mrb[0].mxu0 }
 0x12a   : > { %v344_v21 = vadd.f32 %v553_v19, %v343_v20  ;;  %v611_v22 = vpop.f32.mrb[1].mxu0 }
 0x12b   : > { %v346_v23 = vpop.f32.mrb[2].mxu0 }
 0x12c   : > { %v349_v24 = vmax.f32 %v344_v21, 0.0  ;;  %v612_v25 = vpop.f32.mrb[3].mxu0 }
 0x12e   : > { %630 = vmatmul.mubr.f32.vlgmr.msra.gmra.mrb[0].mxu1 %v349_v24 }
 0x201   : > { %v455_v27 = vpop.f32.mrb[0].mxu1 }
 0x202   : > { %v456_v28 = vadd.f32 %v562_v26, %v455_v27  ;;  %v631_v29 = vpop.f32.mrb[1].mxu1 }
 0x204   : > { %459 = vst [vmem:[%s230_s17] sm:$0xff] %v456_v28 }
 0x205   : > { %743 = shalt.err (!%p740_p7)
}
 0x206   : > { %s744_s10 = scalar_lea.hbm %s957_s6, 128  ;;  %s748_s13 = scalar_lea.hbm %s1004_s5, 256 }
 0x207   : > { %p745_p8 = scmp.ne.s32.totalorder %s957_s6, %s744_s10  ;;  %p749_p1 = scmp.lt.u32.totalorder %s957_s6, %s1004_s5 }
 0x208   : > { %p750_p0 = scmp.lt.u32.totalorder %s748_s13, %s744_s10  ;;  %p752_p6 = scmp.lt.u32.totalorder %s744_s10, %s957_s6 }
 0x209   : > { %p746_p11 = pnand %p745_p8, %p1015_p9 }
 0x20a   : > { %p751_p5 = por %p750_p0, %p749_p1 }
 0x20b   : > { %p747_p13 = pneg %p746_p11 }
 0x20c   : > { %p753_p10 = por %p752_p6, %p751_p5 }
 0x20e   : > { %p754_p12 = pnand %p753_p10, %p747_p13 }
 0x210   : > { %757 = shalt.err (!%p754_p12)
}
 0x211   : > { %636 = dma.vmem_to_hbm [thread:$0]  (%p1015_p9), %s959_s23, 128, %s957_s6, %s461_s8  }
 0x212 PF: > { %p648_p2 = scmp.ge.s32.totalorder %s796_s21, 2  ;;  %s486_s16 = sand.u32 1, %s784_s18  }
 0x213   : > { %p1016_p3 = scmp.ne.s32.totalorder %s1009_s29, 0  ;;  %s487_s17 = scalar_lea.sflag [#allocation4], %s486_s16 }
 0x215   : > { %p643_p4 = pnand %p648_p2, %p1016_p3 }
 0x217   : > { %779 = dma.done.wait (!%p643_p4), %s487_s17, 128  }
 0x218   : > { %781 = vsyncadd (!%p643_p4), %s487_s17, 4294967168  ;;  %p16_p7 = scmp.ge.s32.totalorder %s859_s24, 4   ;;  %s1017_s18 = smov %s788_s19 }
 0x219   : > { %s1018_s19 = smov %s792_s20  ;;  %s1019_s20 = smov %s870_s27 }
 0x21a   : > { %s1020_s21 = smov %s859_s24  ;;  %18 = sbr.rel (!%p16_p7) target bundleno = 4 (0x4), region = 80 }
 0x221   :  { %492 = vsyncpa [#allocation3], 1 }
 0x222   :  { %494 = vsyncpa [#allocation3 + $0x1], 1 }
 0x223   :  { %495 = vsyncpa [#allocation4], 1 }
 0x224   :  { %497 = vsyncpa [#allocation4 + $0x1], 1 }

</bundles_post_ra>
